<compile_context>
chip_gen: v7x
topology: tpu7x:2x2x1
jax: 0.10.0
libtpu: 0.0.40
codegen_flags: <defaults>
</compile_context>

<pallas_src>
import functools

import jax
import jax.numpy as jnp
from jax.experimental import pallas as pl
from jax.experimental.pallas import tpu as pltpu


def _round_up(x, m):
    return ((x + m - 1) // m) * m


def _cdiv(a, b):
    return (a + b - 1) // b


def binary_head_kernel(x_ref, w_ref, bs_ref, o_ref, *, s, matmul_dtype):
    # x_ref: (TB, E), w_ref: (E, Cp), bs_ref: (1, Cp) holding bias*s, o_ref: (TB, Cp)
    x = x_ref[...]
    xf = x.astype(jnp.float32)
    # (x / ||x||_2) @ W * s + b*s  ==  (x @ W) * (rsqrt(sum(x^2)) * s) + b*s
    # NOTE: no epsilon -> an all-zero row gives NaN, matching torch.div(x, 0-norm).
    sumsq = jnp.sum(xf * xf, axis=1, keepdims=True)            # (TB, 1)  VALU, f32
    inv_s = jax.lax.rsqrt(sumsq) * s                           # EUP rsqrt (free slot)
    logits = jnp.dot(x.astype(matmul_dtype), w_ref[...],
                     preferred_element_type=jnp.float32)       # MXU, (TB, Cp)
    o_ref[...] = (logits * inv_s + bs_ref[...]).astype(o_ref.dtype)


def prepare_binary_head_params(weight, bias, *, s=16.0, matmul_dtype=None):
    """One-time (hoisted) param prep. weight: (C, E) as in nn.Linear, bias: (C,).

    Returns (w_t_padded (E, Cp), bias_s_padded (1, Cp) f32, num_class C).
    The class dim is zero-padded to a 128-lane multiple so output stores are
    unmasked, lane-dense vst.
    """
    C, E = weight.shape
    Cp = max(128, _round_up(C, 128))
    w_dt = weight.dtype if matmul_dtype is None else matmul_dtype
    w_t = jnp.pad(weight.T.astype(w_dt), ((0, 0), (0, Cp - C)))            # (E, Cp)
    bs = jnp.pad(bias.astype(jnp.float32) * jnp.float32(s),
                 (0, Cp - C)).reshape(1, Cp)                               # (1, Cp)
    return w_t, bs, C


def binary_head(fea, w_t, bs, num_class, *, s=16.0, block_b=None,
                out_dtype=None, vmem_budget_bytes=None):
    """fea: (B, E); w_t: (E, Cp) pre-padded transposed weight; bs: (1, Cp) = bias*s.
    Returns (B, num_class) logits = l2_norm(fea) @ weight.T * s + bias * s."""
    B, E = fea.shape
    E_w, Cp = w_t.shape
    assert E_w == E and Cp % 128 == 0, "use prepare_binary_head_params()"
    out_dtype = fea.dtype if out_dtype is None else out_dtype

    # --- generation-aware VMEM budget (v5e/v6e: 128 MiB, v7x: 64 MiB per TC) ---
    try:
        vmem_cap = int(pltpu.get_tpu_info().vmem_capacity_bytes)
    except Exception:
        vmem_cap = 64 << 20  # conservative fallback, safe on every generation
    budget = int(vmem_cap * 0.65) if vmem_budget_bytes is None else int(vmem_budget_bytes)
    vmem_limit = int(min(vmem_cap * 0.85, budget + (8 << 20)))

    x_isz = jnp.dtype(fea.dtype).itemsize
    w_isz = jnp.dtype(w_t.dtype).itemsize
    o_isz = jnp.dtype(out_dtype).itemsize

    # Real per-step VMEM footprint:
    #   2 x (TB*E)   x tile   (double-buffered input)
    # + 2 x (TB*Cp)  out tile (double-buffered output)
    # + resident weight (E*Cp) and bias*s (Cp), charged 2x conservatively.
    fixed = 2 * (E * Cp * w_isz + Cp * 4)
    per_row = 2 * (E * x_isz + Cp * o_isz)
    avail = max(budget - fixed, 8 * per_row)
    tb_cap = max(8, (avail // per_row) // 8 * 8)

    TB = tb_cap
    if block_b is not None:
        TB = min(TB, max(8, _round_up(block_b, 8)))
    # Keep >= 2 grid tiles so the "parallel" batch axis can shard across the two
    # TensorCores on v7x (costs nothing on single-TC v5e/v6e).
    TB = min(TB, max(8, _round_up(_cdiv(B, 2), 8)))
    TB = int(min(TB, _round_up(B, 8)))
    Bp = _round_up(B, TB)
    if Bp != B:
        # Padded zero rows produce NaN logits (rsqrt(0)), matching torch.div by a
        # zero norm; they are sliced off below.
        fea = jnp.pad(fea, ((0, Bp - B), (0, 0)))

    grid = (Bp // TB,)
    kernel = functools.partial(binary_head_kernel, s=float(s),
                               matmul_dtype=jnp.dtype(w_t.dtype))

    cost = pl.CostEstimate(
        flops=2 * Bp * E * Cp,
        transcendentals=Bp,
        bytes_accessed=(Bp * E * x_isz          # fea read
                        + E * Cp * w_isz        # weight read (once, resident)
                        + Cp * 4                # bias*s
                        + Bp * Cp * o_isz),     # output writeback
    )

    out = pl.pallas_call(
        kernel,
        out_shape=jax.ShapeDtypeStruct((Bp, Cp), out_dtype),
        grid_spec=pltpu.PrefetchScalarGridSpec(
            num_scalar_prefetch=0,
            grid=grid,
            in_specs=[
                pl.BlockSpec((TB, E), lambda i: (i, 0)),   # streamed batch tiles
                pl.BlockSpec((E, Cp), lambda i: (0, 0)),   # weight stays VMEM-resident
                pl.BlockSpec((1, Cp), lambda i: (0, 0)),   # bias*s stays VMEM-resident
            ],
            out_specs=pl.BlockSpec((TB, Cp), lambda i: (i, 0)),
        ),
        compiler_params=pltpu.CompilerParams(
            dimension_semantics=("parallel",),
            vmem_limit_bytes=vmem_limit,
        ),
        cost_estimate=cost,
    )(fea, w_t, bs)
    return out[:B, :num_class]


if __name__ == "__main__":
    key = jax.random.PRNGKey(0)
    k_fea, k_w, k_b = jax.random.split(key, 3)

    # Small shapes consistent with the module: batch=8, emb_size=256, num_class=5
    B, E, C = 8, 256, 5
    s = 16.0

    fea = jax.random.normal(k_fea, (B, E), dtype=jnp.float32)
    # nn.Linear(emb_size, num_class): weight (C, E), bias (C,)
    w = jax.random.normal(k_w, (C, E), dtype=jnp.float32) * 0.02
    b = jax.random.normal(k_b, (C,), dtype=jnp.float32) * 0.02

    # Param prep (pad/transpose/bias*s) hoisted out of the per-call path.
    w_t, bs, _ = prepare_binary_head_params(w, b, s=s)

    out = jax.block_until_ready(binary_head(fea, w_t, bs, C, s=s))

    # Reference check in plain JAX (matches the PyTorch module semantics).
    norm = jnp.sqrt(jnp.sum(fea * fea, axis=1, keepdims=True))
    ref = ((fea / norm) @ w.T + b[None, :]) * s
    assert out.shape == (B, C)
    assert jnp.allclose(out, ref, atol=1e-4, rtol=1e-4)

    # Exercise the batch-tiled grid + tail padding path (B not a tile multiple).
    B2 = 20
    fea2 = jax.random.normal(jax.random.PRNGKey(1), (B2, E), dtype=jnp.float32)
    out2 = jax.block_until_ready(binary_head(fea2, w_t, bs, C, s=s, block_b=8))
    norm2 = jnp.sqrt(jnp.sum(fea2 * fea2, axis=1, keepdims=True))
    ref2 = ((fea2 / norm2) @ w.T + b[None, :]) * s
    assert out2.shape == (B2, C)
    assert jnp.allclose(out2, ref2, atol=1e-4, rtol=1e-4)

    # bf16 activation path: weight matched to bf16 -> homogeneous full-rate MXU
    # matmul (f32 accumulate), bf16 writeback trims output HBM traffic.
    fea3 = fea.astype(jnp.bfloat16)
    w_t3, bs3, _ = prepare_binary_head_params(w, b, s=s, matmul_dtype=jnp.bfloat16)
    out3 = jax.block_until_ready(binary_head(fea3, w_t3, bs3, C, s=s))
    assert out3.shape == (B, C) and out3.dtype == jnp.bfloat16
    out3_f32 = out3.astype(jnp.float32)
    assert bool(jnp.all(jnp.isfinite(out3_f32)))
    assert jnp.allclose(out3_f32, ref, atol=0.25, rtol=0.05)

    print("KERNEL_OK")
</pallas_src>

<mosaic_0001>
module attributes {stable_mosaic.version = 11 : i64} {
  func.func @binary_head_kernel(%arg0: i32, %arg1: memref<8x256xf32, #tpu.memory_space<vmem>>, %arg2: memref<256x128xf32, #tpu.memory_space<vmem>>, %arg3: memref<1x128xf32, #tpu.memory_space<vmem>>, %arg4: memref<8x128xf32, #tpu.memory_space<vmem>>) attributes {dimension_semantics = [#tpu.dimension_semantics<parallel>], iteration_bounds = array<i64: 1>, scalar_prefetch = 0 : i64, scratch_operands = 0 : i64, tpu.core_type = #tpu.core_type<tc>, window_params = [{transform_indices = @transform_0, window_bounds = array<i64: 8, 256>}, {pipeline_mode = #tpu.pipeline_mode<synchronous>, transform_indices = @transform_1, window_bounds = array<i64: 256, 128>}, {pipeline_mode = #tpu.pipeline_mode<synchronous>, transform_indices = @transform_2, window_bounds = array<i64: 1, 128>}, {transform_indices = @transform_3, window_bounds = array<i64: 8, 128>}]} {
    %c0 = arith.constant 0 : index
    %c0_0 = arith.constant 0 : index
    %0 = vector.load %arg1[%c0, %c0_0] : memref<8x256xf32, #tpu.memory_space<vmem>>, vector<8x256xf32>
    %1 = arith.mulf %0, %0 : vector<8x256xf32>
    %cst = arith.constant dense<0.000000e+00> : vector<8xf32>
    %2 = vector.multi_reduction <add>, %1, %cst [1] : vector<8x256xf32> to vector<8xf32>
    %3 = vector.shape_cast %2 : vector<8xf32> to vector<8x1xf32>
    %4 = math.rsqrt %3 : vector<8x1xf32>
    %cst_1 = arith.constant 1.600000e+01 : f32
    %5 = vector.broadcast %cst_1 : f32 to vector<8x1xf32>
    %6 = arith.mulf %4, %5 : vector<8x1xf32>
    %c0_2 = arith.constant 0 : index
    %c0_3 = arith.constant 0 : index
    %7 = vector.load %arg2[%c0_2, %c0_3] : memref<256x128xf32, #tpu.memory_space<vmem>>, vector<256x128xf32>
    %cst_4 = arith.constant dense<0.000000e+00> : vector<8x128xf32>
    %8 = tpu.matmul %0, %7, %cst_4 {dimension_numbers = #tpu.dot_dimension_numbers<[1], [0], [0], [1], [0, 0, 1, 1], [], []>} : vector<8x256xf32>, vector<256x128xf32>, vector<8x128xf32> -> vector<8x128xf32>
    %9 = vector.broadcast %6 : vector<8x1xf32> to vector<8x128xf32>
    %10 = arith.mulf %8, %9 : vector<8x128xf32>
    %c0_5 = arith.constant 0 : index
    %c0_6 = arith.constant 0 : index
    %11 = vector.load %arg3[%c0_5, %c0_6] : memref<1x128xf32, #tpu.memory_space<vmem>>, vector<1x128xf32>
    %12 = vector.broadcast %11 : vector<1x128xf32> to vector<8x128xf32>
    %13 = arith.addf %10, %12 : vector<8x128xf32>
    %c0_7 = arith.constant 0 : index
    %c0_8 = arith.constant 0 : index
    %14 = vector.load %arg4[%c0_7, %c0_8] : memref<8x128xf32, #tpu.memory_space<vmem>>, vector<8x128xf32>
    tpu.vector_store %arg4[%c0_7, %c0_8], %13 {strides = array<i32>} : memref<8x128xf32, #tpu.memory_space<vmem>>, vector<8x128xf32>,
    return
  }
  func.func @transform_0(%arg0: i32) -> (i32, i32) {
    %c0_i32 = arith.constant 0 : i32
    %c0_i32_0 = arith.constant 0 : i32
    return %arg0, %c0_i32 : i32, i32
  }
  func.func @transform_1(%arg0: i32) -> (i32, i32) {
    %c0_i32 = arith.constant 0 : i32
    %c0_i32_0 = arith.constant 0 : i32
    %c0_i32_1 = arith.constant 0 : i32
    return %c0_i32, %c0_i32_0 : i32, i32
  }
  func.func @transform_2(%arg0: i32) -> (i32, i32) {
    %c0_i32 = arith.constant 0 : i32
    %c0_i32_0 = arith.constant 0 : i32
    %c0_i32_1 = arith.constant 0 : i32
    return %c0_i32, %c0_i32_0 : i32, i32
  }
  func.func @transform_3(%arg0: i32) -> (i32, i32) {
    %c0_i32 = arith.constant 0 : i32
    %c0_i32_0 = arith.constant 0 : i32
    return %arg0, %c0_i32 : i32, i32
  }
}

</mosaic_0001>

<bundles_post_ra>
// kernel: tpu_custom_call.1
= control target key start
LH: loop header
LB: loop body
LE: loop exit
PB: predicated region body
PF: predicated region fallthrough
CT: control target
= control target key end

     0   :  { %8 = vsyncpa [#allocation3], 0  ;;  %s396_s0 = inlined_call_operand.hbm [shape: f32[8,256], index: 0, kind: input, shape index: {}]   ;;  %s397_s1 = inlined_call_operand.hbm [shape: f32[256,128], index: 1, kind: input, shape index: {}]   ;;  %s398_s2 = inlined_call_operand.vmem [shape: f32[1,128], index: 2, kind: input, shape index: {}]   ;;  %s399_s3 = inlined_call_operand.hbm [shape: f32[8,128], index: 3, kind: output, shape index: {}]  }
   0x1   :  { %9 = vsyncpa [#allocation6], 0 }
   0x2   :  { %10 = vsyncpa [#allocation4], 0  ;;  %s325_s12 = smov [#allocation2]   ;;  %s326_s14 = smov [#allocation5]  }
   0x3   :  { %s17_s13 = sshll.u32 %s325_s12, 4  ;;  %s26_s15 = sshll.u32 %s326_s14, 4  ;;  %s18_s13 = int_to_ptr.vmem [resolvable:$true] %s17_s13  ;;  %s350_s15 = int_to_ptr.vmem [resolvable:$true] %s26_s15 }
   0x4   :  { %s253_s18 = scalar_lea.hbm %s396_s0, 256 }
   0x5   :  { %p254_p0 = scmp.ne.s32.totalorder %s396_s0, %s253_s18  ;;  %p257_p1 = scmp.lt.u32.totalorder %s253_s18, %s396_s0 }
   0x7   :  { %p259_p2 = pnand %p257_p1, %p254_p0 }
   0x9   :  { %262 = shalt.err (!%p259_p2)
}
   0xa   :  { %s263_s23 = scalar_lea.vmem %s18_s13, 256  ;;  %p268_p4 = scmp.lt.s32.totalorder %s18_s13, %s18_s13 }
   0xb   :  { %p264_p3 = scmp.ne.s32.totalorder %s18_s13, %s263_s23  ;;  %p269_p5 = scmp.lt.s32.totalorder %s263_s23, %s263_s23 }
   0xd   :  { %p270_p6 = por %p269_p5, %p268_p4 }
   0xf   :  { %p271_p7 = pnand %p270_p6, %p264_p3 }
  0x11   :  { %274 = shalt.err (!%p271_p7)
}
  0x12   :  { %20 = dma.hbm_to_vmem [thread:$0]  %s396_s0, 256, %s18_s13, [#allocation3]  }
  0x13   :  { %s275_s28 = scalar_lea.hbm %s397_s1, 4096 }
  0x14   :  { %p276_p8 = scmp.ne.s32.totalorder %s397_s1, %s275_s28  ;;  %p279_p9 = scmp.lt.u32.totalorder %s275_s28, %s397_s1 }
  0x16   :  { %p281_p10 = pnand %p279_p9, %p276_p8 }
  0x18   :  { %284 = shalt.err (!%p281_p10)
}
  0x19   :  { %s285_s6 = scalar_lea.vmem %s350_s15, 4096  ;;  %p290_p12 = scmp.lt.s32.totalorder %s350_s15, %s350_s15 }
  0x1a   :  { %p286_p11 = scmp.ne.s32.totalorder %s350_s15, %s285_s6  ;;  %p291_p13 = scmp.lt.s32.totalorder %s285_s6, %s285_s6 }
  0x1c   :  { %p292_p0 = por %p291_p13, %p290_p12 }
  0x1e   :  { %p293_p1 = pnand %p292_p0, %p286_p11 }
  0x20   :  { %296 = shalt.err (!%p293_p1)
}
  0x21   :  { %s327_s0 = smov 128   ;;  %s328_s7 = smov 8  }
  0x22   :  { %32 = dma.hbm_to_vmem [thread:$0]  %s397_s1, 4096, %s350_s15, [#allocation6], %s327_s0, %s327_s0, %s328_s7  }
  0x23   :  { %319 = dma.done.wait [#allocation3], 256  }
  0x24   :  { %320 = vsyncadd [#allocation3], 4294967040 }
  0x25   :  { %321 = dma.done.wait [#allocation6], 4096  }
  0x26   :  { %322 = vsyncadd [#allocation6], 4294963200  ;;  %v66_v0 = vld [vmem:[#allocation5 + $0x80] sm:$0xff]  ;;  %v67_v1 = vld [vmem:[#allocation5 + $0x88] sm:$0xff]  ;;  %s329_s11 = smov [#allocation7]  }
  0x27   :  { %v50_v2 = vld [vmem:[#allocation5] sm:$0xff]  ;;  %v214_v3 = vpack.c.bf16 %v67_v1, %v66_v0  ;;  %v51_v4 = vld [vmem:[#allocation5 + $0x8] sm:$0xff]  ;;  %v68_v5 = vld [vmem:[#allocation5 + $0x90] sm:$0xff]  ;;  %s168_s12 = sshll.u32 %s329_s11, 4  ;;  %s169_s12 = int_to_ptr.vmem [resolvable:$true] %s168_s12 }
  0x28   :  { %v69_v6 = vld [vmem:[#allocation5 + $0x98] sm:$0xff]  ;;  %v216_v7 = vpack.c.bf16 %v51_v4, %v50_v2  ;;  %v52_v9 = vld [vmem:[#allocation5 + $0x10] sm:$0xff]  ;;  %v70_v11 = vld [vmem:[#allocation5 + $0xa0] sm:$0xff]  ;;  %s297_s13 = scalar_lea.vmem %s169_s12, 128  ;;  %p302_p3 = scmp.lt.s32.totalorder %s169_s12, %s169_s12 }
  0x29   :  { %v218_v8 = vpack.c.bf16 %v69_v6, %v68_v5  ;;  %v53_v10 = vld [vmem:[#allocation5 + $0x18] sm:$0xff]  ;;  %215 = vmatprep.subr.bf16.mxu0 %v214_v3  ;;  %v71_v12 = vld [vmem:[#allocation5 + $0xa8] sm:$0xff]  ;;  %v54_v15 = vld [vmem:[#allocation5 + $0x20] sm:$0xff]  ;;  %p298_p2 = scmp.ne.s32.totalorder %s169_s12, %s297_s13  ;;  %p303_p4 = scmp.lt.s32.totalorder %s297_s13, %s297_s13 }
  0x2a   :  { %217 = vmatpush3.bf16.msra.mxu0 %v216_v7  ;;  %v220_v13 = vpack.c.bf16 %v53_v10, %v52_v9  ;;  %v222_v14 = vpack.c.bf16 %v71_v12, %v70_v11  ;;  %v55_v16 = vld [vmem:[#allocation5 + $0x28] sm:$0xff]  ;;  %v72_v17 = vld [vmem:[#allocation5 + $0xb0] sm:$0xff]  ;;  %v73_v18 = vld [vmem:[#allocation5 + $0xb8] sm:$0xff] }
  0x2b   :  { %219 = vmatprep.subr.bf16.mxu0 %v218_v8  ;;  %v224_v19 = vpack.c.bf16 %v55_v16, %v54_v15  ;;  %v226_v20 = vpack.c.bf16 %v73_v18, %v72_v17  ;;  %v56_v21 = vld [vmem:[#allocation5 + $0x30] sm:$0xff]  ;;  %v57_v22 = vld [vmem:[#allocation5 + $0x38] sm:$0xff]  ;;  %v74_v23 = vld [vmem:[#allocation5 + $0xc0] sm:$0xff]  ;;  %p304_p5 = por %p303_p4, %p302_p3 }
  0x2c   :  { %v75_v24 = vld [vmem:[#allocation5 + $0xc8] sm:$0xff]  ;;  %v42_v25 = vld [vmem:[#allocation2 + $0x8] sm:$0xff]  ;;  %v41_v27 = vld [vmem:[#allocation2] sm:$0xff]  ;;  %v228_v28 = vpack.c.bf16 %v57_v22, %v56_v21 }
  0x2d   :  { %v44_v26 = vmul.f32 %v42_v25, %v42_v25  ;;  %146 = vmatprep.mubr.f32.mxu0 %v42_v25  ;;  %v43_v29 = vmul.f32 %v41_v27, %v41_v27  ;;  %v230_v30 = vpack.c.bf16 %v75_v24, %v74_v23  ;;  %v58_v31 = vld [vmem:[#allocation5 + $0x40] sm:$0xff]  ;;  %v59_v32 = vld [vmem:[#allocation5 + $0x48] sm:$0xff]  ;;  %v76_v33 = vld [vmem:[#allocation5 + $0xd0] sm:$0xff]  ;;  %p305_p6 = pnand %p304_p5, %p298_p2 }
  0x2e   :  { %221 = vmatpush3.bf16.msra.mxu0 %v220_v13  ;;  %v77_v34 = vld [vmem:[#allocation5 + $0xd8] sm:$0xff]  ;;  %v232_v36 = vpack.c.bf16 %v59_v32, %v58_v31  ;;  %v60_v38 = vld [vmem:[#allocation5 + $0x50] sm:$0xff]  ;;  %v78_v40 = vld [vmem:[#allocation5 + $0xe0] sm:$0xff] }
  0x2f   :  { %223 = vmatprep.subr.bf16.mxu0 %v222_v14  ;;  %v45_v35 = vadd.f32 %v44_v26, %v43_v29  ;;  %v234_v37 = vpack.c.bf16 %v77_v34, %v76_v33  ;;  %v61_v39 = vld [vmem:[#allocation5 + $0x58] sm:$0xff]  ;;  %v79_v41 = vld [vmem:[#allocation5 + $0xe8] sm:$0xff]  ;;  %v62_v44 = vld [vmem:[#allocation5 + $0x60] sm:$0xff] }
  0x30   :  { %v236_v42 = vpack.c.bf16 %v61_v39, %v60_v38  ;;  %v238_v43 = vpack.c.bf16 %v79_v41, %v78_v40  ;;  %v63_v45 = vld [vmem:[#allocation5 + $0x68] sm:$0xff]  ;;  %v80_v46 = vld [vmem:[#allocation5 + $0xf0] sm:$0xff]  ;;  %v81_v47 = vld [vmem:[#allocation5 + $0xf8] sm:$0xff] }
  0x31   :  { %46 = vadd.xlane.f32.xlu0 %v45_v35  ;;  %v240_v48 = vpack.c.bf16 %v63_v45, %v62_v44  ;;  %v242_v49 = vpack.c.bf16 %v81_v47, %v80_v46  ;;  %v64_v50 = vld [vmem:[#allocation5 + $0x70] sm:$0xff]  ;;  %v65_v51 = vld [vmem:[#allocation5 + $0x78] sm:$0xff] }
  0x32   :  { %225 = vmatpush3.bf16.msra.mxu0 %v224_v19  ;;  %v244_v52 = vpack.c.bf16 %v65_v51, %v64_v50  ;;  %v178_v59 = vld [vmem:[%s398_s2] ss:$0 sm:$0xff] }
  0x33   :  { %227 = vmatprep.subr.bf16.mxu0 %v226_v20 }
  0x36   :  { %229 = vmatpush3.bf16.msra.mxu0 %v228_v28 }
  0x37   :  { %231 = vmatprep.subr.bf16.mxu0 %v230_v30 }
  0x3a   :  { %233 = vmatpush3.bf16.msra.mxu0 %v232_v36 }
  0x3b   :  { %235 = vmatprep.subr.bf16.mxu0 %v234_v37 }
  0x3e   :  { %237 = vmatpush3.bf16.msra.mxu0 %v236_v42 }
  0x3f   :  { %239 = vmatprep.subr.bf16.mxu0 %v238_v43 }
  0x42   :  { %241 = vmatpush3.bf16.msra.mxu0 %v240_v48 }
  0x43   :  { %243 = vmatprep.subr.bf16.mxu0 %v242_v49 }
  0x46   :  { %245 = vmatpush3.bf16.msra.mxu0 %v244_v52 }
  0x49   :  { %147 = vmatmul.mubr.f32.vlgmr.msra.gmra.mrb[0].mxu0 %v41_v27 }
  0xbe   :  { %v47_v53 = vpop.xlane.xlu0 %46 }
  0xbf   :  { %251 = vrsqrt.f32 %v47_v53 }
  0xc9   :  { %v252_v54 = vpop.eup %251 }
  0xca   :  { %v49_v55 = vmul.f32 16.0, %v252_v54 }
 0x11c   :  { %v211_v56 = vpop.f32.mrb[0].mxu0 }
 0x11d   :  { %v212_v57 = vpop.f32.mrb[1].mxu0 }
 0x11e   :  { %v213_v58 = vadd.f32 %v212_v57, %v211_v56 }
 0x120   :  { %v152_v60 = vmul.f32 %v213_v58, %v49_v55 }
 0x122   :  { %v160_v61 = vadd.f32 %v178_v59, %v152_v60 }
 0x124   :  { %161 = vst [vmem:[#allocation7] sm:$0xff] %v160_v61 }
 0x125   :  { %308 = shalt.err (!%p305_p6)
}
 0x126   :  { %s309_s16 = scalar_lea.hbm %s399_s3, 128 }
 0x127   :  { %p310_p7 = scmp.ne.s32.totalorder %s399_s3, %s309_s16  ;;  %p313_p8 = scmp.lt.u32.totalorder %s309_s16, %s399_s3 }
 0x129   :  { %p315_p9 = pnand %p313_p8, %p310_p7 }
 0x12b   :  { %318 = shalt.err (!%p315_p9)
}
 0x12c   :  { %171 = dma.vmem_to_hbm [thread:$0]  %s169_s12, 128, %s399_s3, [#allocation4]  }
 0x12d   :  { %323 = dma.done.wait [#allocation4], 128  }
 0x12e   :  { %324 = vsyncadd [#allocation4], 4294967168 }
 0x12f   :  { %175 = vsyncpa [#allocation3], 1 }
 0x130   :  { %176 = vsyncpa [#allocation6], 1 }
 0x131   :  { %177 = vsyncpa [#allocation4], 1 }

</bundles_post_ra>
